<compile_context>
chip_gen: v6e
topology: v6e:2x2x1
jax: 0.10.0
libtpu: 0.0.40
codegen_flags: <defaults>
</compile_context>

<pallas_src>
import math

import jax
import jax.numpy as jnp
from jax import lax
from jax.experimental import pallas as pl
from jax.experimental.pallas import tpu as pltpu

LEAKY_SLOPE = 0.01
BN_EPS = 1e-5
HALF_LOG_2PIE = 0.5 * math.log(2.0 * math.pi * math.e)
MATMUL_DTYPE = jnp.bfloat16  # MXU inputs only; accum + elementwise stay f32


def _round_up(x, m):
    return ((x + m - 1) // m) * m


def _leaky_relu(x):
    return jnp.where(x > 0, x, LEAKY_SLOPE * x)


# ---------------------------------------------------------------------------
# Group-latent-dimension allocation (pure Python, mirrors __init__ logic)
# ---------------------------------------------------------------------------
def compute_groups(input_dim, latent_dim, feature_groups=None,
                   base_compression_level=1.0, min_group_dim=1):
    if feature_groups is None:
        gs = input_dim // 3
        feature_groups = {
            "group1": (0, gs, 1.0),
            "group2": (gs, 2 * gs, 1.0),
            "group3": (2 * gs, input_dim, 1.0),
        }
    names = list(feature_groups.keys())
    total = sum(e - s for s, e, _ in feature_groups.values())
    intended = {
        n: max(min_group_dim,
               int(latent_dim * (feature_groups[n][1] - feature_groups[n][0]) / total))
        for n in names
    }
    remaining = latent_dim - sum(intended.values())
    if remaining != 0:
        sorted_groups = sorted(intended.items(),
                               key=lambda kv: feature_groups[kv[0]][2])
        if remaining > 0:
            for i in range(remaining):
                intended[sorted_groups[i % len(sorted_groups)][0]] += 1
        else:
            sorted_groups.reverse()
            for _ in range(-remaining):
                for name, _dim in sorted_groups:
                    if intended[name] > min_group_dim:
                        intended[name] -= 1
                        break
    group_latent = {}
    eff_dims = {}
    start = 0
    for n in names:
        gdim = intended[n]
        comp = feature_groups[n][2] * base_compression_level
        group_latent[n] = (start, start + gdim)
        eff_dims[n] = max(1, int(gdim / comp))
        start += gdim
    return feature_groups, group_latent, eff_dims


# ---------------------------------------------------------------------------
# Parameter init (PyTorch-Linear-style uniform) -> raw, per-module params
# ---------------------------------------------------------------------------
def _linear_init(key, fan_in, fan_out):
    kw, kb = jax.random.split(key)
    bound = 1.0 / math.sqrt(fan_in)
    w = jax.random.uniform(kw, (fan_in, fan_out), jnp.float32, -bound, bound)
    b = jax.random.uniform(kb, (1, fan_out), jnp.float32, -bound, bound)
    return w, b


def init_raw_params(key, input_dim, latent_dim, hidden_dims, group_latent, eff_dims):
    h1, h2 = hidden_dims
    keys = iter(jax.random.split(key, 64))
    p = {}
    p["enc_w1"], p["enc_b1"] = _linear_init(next(keys), input_dim, h1)
    p["enc_w2"], p["enc_b2"] = _linear_init(next(keys), h1, h2)
    p["enc_wmu"], p["enc_bmu"] = _linear_init(next(keys), h2, latent_dim)
    p["enc_wlv"], p["enc_blv"] = _linear_init(next(keys), h2, latent_dim)
    p["groups"] = {}
    for name, (s, e) in group_latent.items():
        gdim = e - s
        ed = eff_dims[name]
        wd, bd = _linear_init(next(keys), gdim, ed)
        wu, bu = _linear_init(next(keys), ed, 2 * gdim)
        p["groups"][name] = (wd, bd, wu, bu)
    p["dec_w1"], p["dec_b1"] = _linear_init(next(keys), latent_dim, h2)
    p["dec_w2"], p["dec_b2"] = _linear_init(next(keys), h2, h1)
    p["dec_wo"], p["dec_bo"] = _linear_init(next(keys), h1, input_dim)
    return p


# ---------------------------------------------------------------------------
# Pack params at trace time: BN fold, lane-aligned head fusion, block-diagonal
# bottleneck, 128-aligned bias slab, bf16 cast of all MXU inputs.
# ---------------------------------------------------------------------------
def pack_params(p, group_latent, eff_dims, input_dim, latent_dim, hidden_dims):
    # TODO(synk): fresh eval BatchNorm stats assumed (mean=0, var=1, gamma=1,
    # beta=0); fold real running stats here if trained weights are loaded.
    h1, h2 = hidden_dims
    L = latent_dim
    LP = _round_up(max(L, 1), 128)          # lane-aligned latent segment width
    bn_scale = 1.0 / math.sqrt(1.0 + BN_EPS)

    def fold_bn(w, b):
        return w * bn_scale, b * bn_scale

    w1, b1 = fold_bn(p["enc_w1"], p["enc_b1"])
    w2, b2 = fold_bn(p["enc_w2"], p["enc_b2"])

    # fused mu|log_var head, lane-aligned: mu cols in [0:L), log_var in [LP:LP+L)
    wh = jnp.zeros((h2, 2 * LP), jnp.float32)
    wh = wh.at[:, :L].set(p["enc_wmu"])
    wh = wh.at[:, LP:LP + L].set(p["enc_wlv"])
    bh = jnp.zeros((1, 2 * LP), jnp.float32)
    bh = bh.at[:, :L].set(p["enc_bmu"])
    bh = bh.at[:, LP:LP + L].set(p["enc_blv"])

    # block-diagonal packed bottleneck; proj_up columns lane-aligned likewise
    names = list(group_latent.keys())
    n_groups = len(names)
    total_eff = sum(eff_dims[n] for n in names)
    wdn = jnp.zeros((L, total_eff), jnp.float32)
    bdn = jnp.zeros((1, total_eff), jnp.float32)
    wup = jnp.zeros((total_eff, 2 * LP), jnp.float32)
    bup = jnp.zeros((1, 2 * LP), jnp.float32)
    gw = jnp.zeros((1, L), jnp.float32)   # per-column compression-loss weight
    off = 0
    for name in names:
        s, e = group_latent[name]
        gdim = e - s
        ed = eff_dims[name]
        wd, bd, wu, bu = p["groups"][name]
        wdn = wdn.at[s:e, off:off + ed].set(wd)
        bdn = bdn.at[:, off:off + ed].set(bd)
        wup = wup.at[off:off + ed, s:e].set(wu[:, :gdim])
        wup = wup.at[off:off + ed, LP + s:LP + e].set(wu[:, gdim:])
        bup = bup.at[:, s:e].set(bu[:, :gdim])
        bup = bup.at[:, LP + s:LP + e].set(bu[:, gdim:])
        gw = gw.at[:, s:e].set(1.0 / (n_groups * gdim))
        off += ed

    dw1, db1 = fold_bn(p["dec_w1"], p["dec_b1"])
    dw2, db2 = fold_bn(p["dec_w2"], p["dec_b2"])
    dwo, dbo = p["dec_wo"], p["dec_bo"]

    # single bias slab, each segment padded to a 128-lane boundary so in-kernel
    # static slices are vreg-aligned
    segs = [("b1", b1), ("b2", b2), ("bh", bh), ("bdn", bdn), ("bup", bup),
            ("db1", db1), ("db2", db2), ("dbo", dbo)]
    offsets, widths, cols, cur = {}, {}, [], 0
    for name, arr in segs:
        w = arr.shape[1]
        wpad = _round_up(w, 128)
        offsets[name] = cur
        widths[name] = w
        cols.append(jnp.zeros((1, wpad), jnp.float32).at[:, :w].set(arr))
        cur += wpad
    bias_slab = jnp.concatenate(cols, axis=1)

    cast = lambda w: w.astype(MATMUL_DTYPE)
    weights = [cast(w1), cast(w2), cast(wh), cast(wdn), cast(wup),
               cast(dw1), cast(dw2), cast(dwo)]
    return {"weights": weights, "biases": bias_slab, "gw": gw,
            "bias_offsets": offsets, "bias_widths": widths,
            "LP": LP, "total_eff": total_eff}


# ---------------------------------------------------------------------------
# Fused Pallas kernel: one batch tile of the full forward pass
# ---------------------------------------------------------------------------
def _make_kernel(input_dim, latent_dim, LP, hidden_dims, total_eff,
                 bias_offsets, bias_widths, tile_b, batch):
    h1, h2 = hidden_dims
    L = latent_dim
    needs_mask = (batch % tile_b) != 0

    def kernel(x_ref, w1, w2, wh, wdn, wup, dw1, dw2, dwo, b_ref, gw_ref,
               out_ref, loss_ref):
        x = x_ref[...]

        def bias(name):
            off = bias_offsets[name]         # 128-aligned static offset
            return b_ref[:, off:off + bias_widths[name]]

        def mm(a, w_ref):
            # bf16 MXU inputs (each activation cast exactly once), f32 accum
            return jnp.dot(a.astype(MATMUL_DTYPE), w_ref[...],
                           preferred_element_type=jnp.float32)

        # ----- encoder (BatchNorm already folded into the Linears) -----
        h = _leaky_relu(mm(x, w1) + bias("b1"))
        h = _leaky_relu(mm(h, w2) + bias("b2"))
        head = mm(h, wh) + bias("bh")          # (TB, 2*LP): mu | pad | log_var | pad
        mu = head[:, :L]
        log_var = head[:, LP:LP + L]           # vreg-aligned slice (no lane shift)
        # eval-mode reparameterization: z = mu
        out_ref[:, input_dim:input_dim + L] = mu
        out_ref[:, input_dim + L:input_dim + 2 * L] = log_var

        # ----- grouped entropy bottlenecks: block-diagonal packed matmuls -----
        zd = _leaky_relu(mm(mu, wdn) + bias("bdn"))
        proj = mm(zd, wup) + bias("bup")       # (TB, 2*LP): mu_g | pad | log_scale_g | pad
        mu_all = proj[:, :L]
        log_scale = proj[:, LP:LP + L]
        zc = jnp.round(mu_all)                 # eval-mode quantization
        out_ref[:, input_dim + 2 * L:input_dim + 3 * L] = zc

        # ----- decoder -----
        d = _leaky_relu(mm(zc, dw1) + bias("db1"))
        d = _leaky_relu(mm(d, dw2) + bias("db2"))
        out_ref[:, :input_dim] = mm(d, dwo) + bias("dbo")

        # ----- per-tile loss partial sums (scalars -> SMEM) -----
        # TODO(synk): exact AdaptiveEntropyBottleneck loss unavailable; Gaussian
        # differential-entropy estimate used. gw folds 1/(n_groups*group_dim);
        # -0.5/B, 1/B and 0.5*log(2*pi*e) applied in the wrapper.
        kl_el = 1.0 + log_var - mu * mu - jnp.exp(log_var)
        comp_el = log_scale * gw_ref[...]
        if needs_mask:
            i = pl.program_id(0)
            row = lax.broadcasted_iota(jnp.int32, (tile_b, 1), 0)
            valid = (row + i * tile_b) < batch
            kl_el = jnp.where(valid, kl_el, 0.0)
            comp_el = jnp.where(valid, comp_el, 0.0)
        loss_ref[0, 0] = jnp.sum(kl_el)
        loss_ref[0, 1] = jnp.sum(comp_el)

    return kernel


# ---------------------------------------------------------------------------
# Wrapper: batch grid, VMEM-resident weights, coalesced lane-dense output slab
# ---------------------------------------------------------------------------
def feature_grouped_vae_forward(x, packed, group_latent, input_dim, latent_dim,
                                hidden_dims, tile_batch=256):
    B = x.shape[0]
    L = latent_dim
    LP = packed["LP"]
    weights = packed["weights"]

    # batch tile: multiple of 8 (sublanes); sweep 128 (v5e) / 256+ (v6e/v7x)
    TB = min(tile_batch, _round_up(B, 8))
    B_pad = _round_up(B, TB)
    if B_pad != B:
        x = jnp.pad(x, ((0, B_pad - B), (0, 0)))
    num_tiles = B_pad // TB

    out_w = _round_up(input_dim + 3 * L, 128)   # lane-dense output slab width

    kernel = _make_kernel(input_dim, L, LP, hidden_dims, packed["total_eff"],
                          packed["bias_offsets"], packed["bias_widths"], TB, B)

    inputs = [x] + weights + [packed["biases"], packed["gw"]]

    def resident(arr):   # full block + constant index_map -> stays in VMEM
        return pl.BlockSpec(arr.shape, lambda i: (0, 0))

    in_specs = ([pl.BlockSpec((TB, input_dim), lambda i: (i, 0))]
                + [resident(w) for w in weights]
                + [resident(packed["biases"]), resident(packed["gw"])])

    out_shape = (
        jax.ShapeDtypeStruct((B_pad, out_w), jnp.float32),       # recon|mu|log_var|zc|pad
        jax.ShapeDtypeStruct((num_tiles, 2), jnp.float32),       # per-tile loss partials
    )
    out_specs = (
        pl.BlockSpec((TB, out_w), lambda i: (i, 0)),
        pl.BlockSpec((1, 2), lambda i: (i, 0),
                     memory_space=pltpu.MemorySpace.SMEM),
    )

    # explicit VMEM budget (v7x physical VMEM is 64 MiB; leave headroom)
    weight_bytes = sum(int(w.size) * w.dtype.itemsize for w in weights)
    io_bytes = TB * (input_dim + out_w) * 4
    h1, h2 = hidden_dims
    act_bytes = TB * 4 * (2 * h1 + 2 * h2 + 4 * LP + packed["total_eff"] + input_dim)
    est = 2 * (weight_bytes + io_bytes) + 2 * act_bytes
    vmem_limit = int(min(max(2 * est, 32 * 2**20), 56 * 2**20))

    slab, losses = pl.pallas_call(
        kernel,
        grid=(num_tiles,),
        out_shape=out_shape,
        in_specs=in_specs,
        out_specs=out_specs,
        compiler_params=pltpu.CompilerParams(
            dimension_semantics=("parallel",),      # megacore-shard batch on v7x
            vmem_limit_bytes=vmem_limit),
    )(*inputs)

    recon = slab[:B, :input_dim]
    mu = slab[:B, input_dim:input_dim + L]
    log_var = slab[:B, input_dim + L:input_dim + 2 * L]
    zc = slab[:B, input_dim + 2 * L:input_dim + 3 * L]
    kl_loss = -0.5 * jnp.sum(losses[:, 0]) / B
    compression_loss = HALF_LOG_2PIE + jnp.sum(losses[:, 1]) / B
    return {
        "reconstruction": recon,
        "mu": mu,
        "log_var": log_var,
        "z": mu,                       # eval mode: z == mu (aliased, no extra output)
        "z_compressed": zc,
        "kl_loss": kl_loss,
        "compression_loss": compression_loss,
        "feature_group_dims": group_latent,
    }


if __name__ == "__main__":
    INPUT_DIM = 48
    LATENT_DIM = 16
    BATCH = 8
    HIDDEN_DIMS = (256, 128)

    feature_groups, group_latent, eff_dims = compute_groups(
        INPUT_DIM, LATENT_DIM, feature_groups=None,
        base_compression_level=1.0, min_group_dim=1)

    key = jax.random.PRNGKey(0)
    kx, kp = jax.random.split(key)
    x = jax.random.normal(kx, (BATCH, INPUT_DIM), dtype=jnp.float32)

    raw = init_raw_params(kp, INPUT_DIM, LATENT_DIM, HIDDEN_DIMS,
                          group_latent, eff_dims)
    packed = pack_params(raw, group_latent, eff_dims,
                         INPUT_DIM, LATENT_DIM, HIDDEN_DIMS)

    out = feature_grouped_vae_forward(x, packed, group_latent,
                                      INPUT_DIM, LATENT_DIM, HIDDEN_DIMS)
    jax.block_until_ready(out)

    assert out["reconstruction"].shape == (BATCH, INPUT_DIM)
    assert out["mu"].shape == (BATCH, LATENT_DIM)
    assert out["log_var"].shape == (BATCH, LATENT_DIM)
    assert out["z"].shape == (BATCH, LATENT_DIM)
    assert out["z_compressed"].shape == (BATCH, LATENT_DIM)
    assert out["kl_loss"].shape == ()
    assert out["compression_loss"].shape == ()
    assert bool(jnp.isfinite(out["kl_loss"]))
    assert bool(jnp.isfinite(out["compression_loss"]))
    print("KERNEL_OK")
</pallas_src>

<mosaic_0001>
module attributes {stable_mosaic.version = 11 : i64} {
  func.func @kernel(%arg0: i32, %arg1: memref<8x48xf32, #tpu.memory_space<vmem>>, %arg2: memref<48x256xbf16, #tpu.memory_space<vmem>>, %arg3: memref<256x128xbf16, #tpu.memory_space<vmem>>, %arg4: memref<128x256xbf16, #tpu.memory_space<vmem>>, %arg5: memref<16x16xbf16, #tpu.memory_space<vmem>>, %arg6: memref<16x256xbf16, #tpu.memory_space<vmem>>, %arg7: memref<16x128xbf16, #tpu.memory_space<vmem>>, %arg8: memref<128x256xbf16, #tpu.memory_space<vmem>>, %arg9: memref<256x48xbf16, #tpu.memory_space<vmem>>, %arg10: memref<1x1536xf32, #tpu.memory_space<vmem>>, %arg11: memref<1x16xf32, #tpu.memory_space<vmem>>, %arg12: memref<8x128xf32, #tpu.memory_space<vmem>>, %arg13: memref<1x2xf32, #tpu.memory_space<smem>>) attributes {dimension_semantics = [#tpu.dimension_semantics<parallel>], iteration_bounds = array<i64: 1>, scalar_prefetch = 0 : i64, scratch_operands = 0 : i64, tpu.core_type = #tpu.core_type<tc>, window_params = [{transform_indices = @transform_0, window_bounds = array<i64: 8, 48>}, {pipeline_mode = #tpu.pipeline_mode<synchronous>, transform_indices = @transform_1, window_bounds = array<i64: 48, 256>}, {pipeline_mode = #tpu.pipeline_mode<synchronous>, transform_indices = @transform_2, window_bounds = array<i64: 256, 128>}, {pipeline_mode = #tpu.pipeline_mode<synchronous>, transform_indices = @transform_3, window_bounds = array<i64: 128, 256>}, {pipeline_mode = #tpu.pipeline_mode<synchronous>, transform_indices = @transform_4, window_bounds = array<i64: 16, 16>}, {pipeline_mode = #tpu.pipeline_mode<synchronous>, transform_indices = @transform_5, window_bounds = array<i64: 16, 256>}, {pipeline_mode = #tpu.pipeline_mode<synchronous>, transform_indices = @transform_6, window_bounds = array<i64: 16, 128>}, {pipeline_mode = #tpu.pipeline_mode<synchronous>, transform_indices = @transform_7, window_bounds = array<i64: 128, 256>}, {pipeline_mode = #tpu.pipeline_mode<synchronous>, transform_indices = @transform_8, window_bounds = array<i64: 256, 48>}, {pipeline_mode = #tpu.pipeline_mode<synchronous>, transform_indices = @transform_9, window_bounds = array<i64: 1, 1536>}, {pipeline_mode = #tpu.pipeline_mode<synchronous>, transform_indices = @transform_10, window_bounds = array<i64: 1, 16>}, {transform_indices = @transform_11, window_bounds = array<i64: 8, 128>}, {transform_indices = @transform_12, window_bounds = array<i64: 1, 2>}]} {
    %c0 = arith.constant 0 : index
    %c0_0 = arith.constant 0 : index
    %0 = vector.load %arg1[%c0, %c0_0] : memref<8x48xf32, #tpu.memory_space<vmem>>, vector<8x48xf32>
    %1 = arith.truncf %0 : vector<8x48xf32> to vector<8x48xbf16>
    %c0_1 = arith.constant 0 : index
    %c0_2 = arith.constant 0 : index
    %2 = vector.load %arg2[%c0_1, %c0_2] : memref<48x256xbf16, #tpu.memory_space<vmem>>, vector<48x256xbf16>
    %cst = arith.constant dense<0.000000e+00> : vector<8x256xf32>
    %3 = tpu.matmul %1, %2, %cst {dimension_numbers = #tpu.dot_dimension_numbers<[1], [0], [0], [1], [0, 0, 1, 1], [], []>} : vector<8x48xbf16>, vector<48x256xbf16>, vector<8x256xf32> -> vector<8x256xf32>
    %c0_3 = arith.constant 0 : index
    %c0_4 = arith.constant 0 : index
    %4 = vector.load %arg10[%c0_3, %c0_4] : memref<1x1536xf32, #tpu.memory_space<vmem>>, vector<1x256xf32>
    %5 = vector.broadcast %4 : vector<1x256xf32> to vector<8x256xf32>
    %6 = arith.addf %3, %5 : vector<8x256xf32>
    %cst_5 = arith.constant 0.000000e+00 : f32
    %7 = vector.broadcast %cst_5 : f32 to vector<8x256xf32>
    %8 = arith.cmpf ogt, %6, %7 : vector<8x256xf32>
    %cst_6 = arith.constant 0.00999999977 : f32
    %9 = vector.broadcast %cst_6 : f32 to vector<8x256xf32>
    %10 = arith.mulf %9, %6 : vector<8x256xf32>
    %11 = arith.select %8, %6, %10 : vector<8x256xi1>, vector<8x256xf32>
    %12 = arith.truncf %11 : vector<8x256xf32> to vector<8x256xbf16>
    %c0_7 = arith.constant 0 : index
    %c0_8 = arith.constant 0 : index
    %13 = vector.load %arg3[%c0_7, %c0_8] : memref<256x128xbf16, #tpu.memory_space<vmem>>, vector<256x128xbf16>
    %cst_9 = arith.constant dense<0.000000e+00> : vector<8x128xf32>
    %14 = tpu.matmul %12, %13, %cst_9 {dimension_numbers = #tpu.dot_dimension_numbers<[1], [0], [0], [1], [0, 0, 1, 1], [], []>} : vector<8x256xbf16>, vector<256x128xbf16>, vector<8x128xf32> -> vector<8x128xf32>
    %c0_10 = arith.constant 0 : index
    %c256 = arith.constant 256 : index
    %15 = vector.load %arg10[%c0_10, %c256] : memref<1x1536xf32, #tpu.memory_space<vmem>>, vector<1x128xf32>
    %16 = vector.broadcast %15 : vector<1x128xf32> to vector<8x128xf32>
    %17 = arith.addf %14, %16 : vector<8x128xf32>
    %cst_11 = arith.constant 0.000000e+00 : f32
    %18 = vector.broadcast %cst_11 : f32 to vector<8x128xf32>
    %19 = arith.cmpf ogt, %17, %18 : vector<8x128xf32>
    %cst_12 = arith.constant 0.00999999977 : f32
    %20 = vector.broadcast %cst_12 : f32 to vector<8x128xf32>
    %21 = arith.mulf %20, %17 : vector<8x128xf32>
    %22 = arith.select %19, %17, %21 : vector<8x128xi1>, vector<8x128xf32>
    %23 = arith.truncf %22 : vector<8x128xf32> to vector<8x128xbf16>
    %c0_13 = arith.constant 0 : index
    %c0_14 = arith.constant 0 : index
    %24 = vector.load %arg4[%c0_13, %c0_14] : memref<128x256xbf16, #tpu.memory_space<vmem>>, vector<128x256xbf16>
    %cst_15 = arith.constant dense<0.000000e+00> : vector<8x256xf32>
    %25 = tpu.matmul %23, %24, %cst_15 {dimension_numbers = #tpu.dot_dimension_numbers<[1], [0], [0], [1], [0, 0, 1, 1], [], []>} : vector<8x128xbf16>, vector<128x256xbf16>, vector<8x256xf32> -> vector<8x256xf32>
    %c0_16 = arith.constant 0 : index
    %c384 = arith.constant 384 : index
    %26 = vector.load %arg10[%c0_16, %c384] : memref<1x1536xf32, #tpu.memory_space<vmem>>, vector<1x256xf32>
    %27 = vector.broadcast %26 : vector<1x256xf32> to vector<8x256xf32>
    %28 = arith.addf %25, %27 : vector<8x256xf32>
    %29 = vector.extract_strided_slice %28 {offsets = [0, 0], sizes = [8, 16], strides = [1, 1]} : vector<8x256xf32> to vector<8x16xf32>
    %30 = vector.extract_strided_slice %28 {offsets = [0, 128], sizes = [8, 16], strides = [1, 1]} : vector<8x256xf32> to vector<8x16xf32>
    %c0_17 = arith.constant 0 : index
    %c48 = arith.constant 48 : index
    %31 = vector.load %arg12[%c0_17, %c48] : memref<8x128xf32, #tpu.memory_space<vmem>>, vector<8x16xf32>
    tpu.vector_store %arg12[%c0_17, %c48], %29 {strides = array<i32>} : memref<8x128xf32, #tpu.memory_space<vmem>>, vector<8x16xf32>,
    %c0_18 = arith.constant 0 : index
    %c64 = arith.constant 64 : index
    %32 = vector.load %arg12[%c0_18, %c64] : memref<8x128xf32, #tpu.memory_space<vmem>>, vector<8x16xf32>
    tpu.vector_store %arg12[%c0_18, %c64], %30 {strides = array<i32>} : memref<8x128xf32, #tpu.memory_space<vmem>>, vector<8x16xf32>,
    %33 = arith.truncf %29 : vector<8x16xf32> to vector<8x16xbf16>
    %c0_19 = arith.constant 0 : index
    %c0_20 = arith.constant 0 : index
    %34 = vector.load %arg5[%c0_19, %c0_20] : memref<16x16xbf16, #tpu.memory_space<vmem>>, vector<16x16xbf16>
    %cst_21 = arith.constant dense<0.000000e+00> : vector<8x16xf32>
    %35 = tpu.matmul %33, %34, %cst_21 {dimension_numbers = #tpu.dot_dimension_numbers<[1], [0], [0], [1], [0, 0, 1, 1], [], []>} : vector<8x16xbf16>, vector<16x16xbf16>, vector<8x16xf32> -> vector<8x16xf32>
    %c0_22 = arith.constant 0 : index
    %c640 = arith.constant 640 : index
    %36 = vector.load %arg10[%c0_22, %c640] : memref<1x1536xf32, #tpu.memory_space<vmem>>, vector<1x16xf32>
    %37 = vector.broadcast %36 : vector<1x16xf32> to vector<8x16xf32>
    %38 = arith.addf %35, %37 : vector<8x16xf32>
    %cst_23 = arith.constant 0.000000e+00 : f32
    %39 = vector.broadcast %cst_23 : f32 to vector<8x16xf32>
    %40 = arith.cmpf ogt, %38, %39 : vector<8x16xf32>
    %cst_24 = arith.constant 0.00999999977 : f32
    %41 = vector.broadcast %cst_24 : f32 to vector<8x16xf32>
    %42 = arith.mulf %41, %38 : vector<8x16xf32>
    %43 = arith.select %40, %38, %42 : vector<8x16xi1>, vector<8x16xf32>
    %44 = arith.truncf %43 : vector<8x16xf32> to vector<8x16xbf16>
    %c0_25 = arith.constant 0 : index
    %c0_26 = arith.constant 0 : index
    %45 = vector.load %arg6[%c0_25, %c0_26] : memref<16x256xbf16, #tpu.memory_space<vmem>>, vector<16x256xbf16>
    %cst_27 = arith.constant dense<0.000000e+00> : vector<8x256xf32>
    %46 = tpu.matmul %44, %45, %cst_27 {dimension_numbers = #tpu.dot_dimension_numbers<[1], [0], [0], [1], [0, 0, 1, 1], [], []>} : vector<8x16xbf16>, vector<16x256xbf16>, vector<8x256xf32> -> vector<8x256xf32>
    %c0_28 = arith.constant 0 : index
    %c768 = arith.constant 768 : index
    %47 = vector.load %arg10[%c0_28, %c768] : memref<1x1536xf32, #tpu.memory_space<vmem>>, vector<1x256xf32>
    %48 = vector.broadcast %47 : vector<1x256xf32> to vector<8x256xf32>
    %49 = arith.addf %46, %48 : vector<8x256xf32>
    %50 = vector.extract_strided_slice %49 {offsets = [0, 0], sizes = [8, 16], strides = [1, 1]} : vector<8x256xf32> to vector<8x16xf32>
    %51 = vector.extract_strided_slice %49 {offsets = [0, 128], sizes = [8, 16], strides = [1, 1]} : vector<8x256xf32> to vector<8x16xf32>
    %52 = math.roundeven %50 : vector<8x16xf32>
    %c0_29 = arith.constant 0 : index
    %c80 = arith.constant 80 : index
    %53 = vector.load %arg12[%c0_29, %c80] : memref<8x128xf32, #tpu.memory_space<vmem>>, vector<8x16xf32>
    tpu.vector_store %arg12[%c0_29, %c80], %52 {strides = array<i32>} : memref<8x128xf32, #tpu.memory_space<vmem>>, vector<8x16xf32>,
    %54 = arith.truncf %52 : vector<8x16xf32> to vector<8x16xbf16>
    %c0_30 = arith.constant 0 : index
    %c0_31 = arith.constant 0 : index
    %55 = vector.load %arg7[%c0_30, %c0_31] : memref<16x128xbf16, #tpu.memory_space<vmem>>, vector<16x128xbf16>
    %cst_32 = arith.constant dense<0.000000e+00> : vector<8x128xf32>
    %56 = tpu.matmul %54, %55, %cst_32 {dimension_numbers = #tpu.dot_dimension_numbers<[1], [0], [0], [1], [0, 0, 1, 1], [], []>} : vector<8x16xbf16>, vector<16x128xbf16>, vector<8x128xf32> -> vector<8x128xf32>
    %c0_33 = arith.constant 0 : index
    %c1024 = arith.constant 1024 : index
    %57 = vector.load %arg10[%c0_33, %c1024] : memref<1x1536xf32, #tpu.memory_space<vmem>>, vector<1x128xf32>
    %58 = vector.broadcast %57 : vector<1x128xf32> to vector<8x128xf32>
    %59 = arith.addf %56, %58 : vector<8x128xf32>
    %cst_34 = arith.constant 0.000000e+00 : f32
    %60 = vector.broadcast %cst_34 : f32 to vector<8x128xf32>
    %61 = arith.cmpf ogt, %59, %60 : vector<8x128xf32>
    %cst_35 = arith.constant 0.00999999977 : f32
    %62 = vector.broadcast %cst_35 : f32 to vector<8x128xf32>
    %63 = arith.mulf %62, %59 : vector<8x128xf32>
    %64 = arith.select %61, %59, %63 : vector<8x128xi1>, vector<8x128xf32>
    %65 = arith.truncf %64 : vector<8x128xf32> to vector<8x128xbf16>
    %c0_36 = arith.constant 0 : index
    %c0_37 = arith.constant 0 : index
    %66 = vector.load %arg8[%c0_36, %c0_37] : memref<128x256xbf16, #tpu.memory_space<vmem>>, vector<128x256xbf16>
    %cst_38 = arith.constant dense<0.000000e+00> : vector<8x256xf32>
    %67 = tpu.matmul %65, %66, %cst_38 {dimension_numbers = #tpu.dot_dimension_numbers<[1], [0], [0], [1], [0, 0, 1, 1], [], []>} : vector<8x128xbf16>, vector<128x256xbf16>, vector<8x256xf32> -> vector<8x256xf32>
    %c0_39 = arith.constant 0 : index
    %c1152 = arith.constant 1152 : index
    %68 = vector.load %arg10[%c0_39, %c1152] : memref<1x1536xf32, #tpu.memory_space<vmem>>, vector<1x256xf32>
    %69 = vector.broadcast %68 : vector<1x256xf32> to vector<8x256xf32>
    %70 = arith.addf %67, %69 : vector<8x256xf32>
    %cst_40 = arith.constant 0.000000e+00 : f32
    %71 = vector.broadcast %cst_40 : f32 to vector<8x256xf32>
    %72 = arith.cmpf ogt, %70, %71 : vector<8x256xf32>
    %cst_41 = arith.constant 0.00999999977 : f32
    %73 = vector.broadcast %cst_41 : f32 to vector<8x256xf32>
    %74 = arith.mulf %73, %70 : vector<8x256xf32>
    %75 = arith.select %72, %70, %74 : vector<8x256xi1>, vector<8x256xf32>
    %76 = arith.truncf %75 : vector<8x256xf32> to vector<8x256xbf16>
    %c0_42 = arith.constant 0 : index
    %c0_43 = arith.constant 0 : index
    %77 = vector.load %arg9[%c0_42, %c0_43] : memref<256x48xbf16, #tpu.memory_space<vmem>>, vector<256x48xbf16>
    %cst_44 = arith.constant dense<0.000000e+00> : vector<8x48xf32>
    %78 = tpu.matmul %76, %77, %cst_44 {dimension_numbers = #tpu.dot_dimension_numbers<[1], [0], [0], [1], [0, 0, 1, 1], [], []>} : vector<8x256xbf16>, vector<256x48xbf16>, vector<8x48xf32> -> vector<8x48xf32>
    %c0_45 = arith.constant 0 : index
    %c1408 = arith.constant 1408 : index
    %79 = vector.load %arg10[%c0_45, %c1408] : memref<1x1536xf32, #tpu.memory_space<vmem>>, vector<1x48xf32>
    %80 = vector.broadcast %79 : vector<1x48xf32> to vector<8x48xf32>
    %81 = arith.addf %78, %80 : vector<8x48xf32>
    %c0_46 = arith.constant 0 : index
    %c0_47 = arith.constant 0 : index
    %82 = vector.load %arg12[%c0_46, %c0_47] : memref<8x128xf32, #tpu.memory_space<vmem>>, vector<8x48xf32>
    tpu.vector_store %arg12[%c0_46, %c0_47], %81 {strides = array<i32>} : memref<8x128xf32, #tpu.memory_space<vmem>>, vector<8x48xf32>,
    %cst_48 = arith.constant 1.000000e+00 : f32
    %83 = vector.broadcast %cst_48 : f32 to vector<8x16xf32>
    %84 = arith.addf %83, %30 : vector<8x16xf32>
    %85 = arith.mulf %29, %29 : vector<8x16xf32>
    %86 = arith.subf %84, %85 : vector<8x16xf32>
    %87 = math.exp %30 : vector<8x16xf32>
    %88 = arith.subf %86, %87 : vector<8x16xf32>
    %c0_49 = arith.constant 0 : index
    %c0_50 = arith.constant 0 : index
    %89 = vector.load %arg11[%c0_49, %c0_50] : memref<1x16xf32, #tpu.memory_space<vmem>>, vector<1x16xf32>
    %90 = vector.broadcast %89 : vector<1x16xf32> to vector<8x16xf32>
    %91 = arith.mulf %51, %90 : vector<8x16xf32>
    %92 = vector.shape_cast %88 : vector<8x16xf32> to vector<1x8x16xf32>
    %cst_51 = arith.constant dense<0.000000e+00> : vector<1xf32>
    %93 = vector.multi_reduction <add>, %92, %cst_51 [1, 2] : vector<1x8x16xf32> to vector<1xf32>
    %94 = vector.shape_cast %93 : vector<1xf32> to vector<1x1x1xf32>
    %95 = vector.extract %94[0, 0, 0] : f32 from vector<1x1x1xf32>
    %c0_52 = arith.constant 0 : index
    %c0_53 = arith.constant 0 : index
    %96 = memref.load %arg13[%c0_52, %c0_53] : memref<1x2xf32, #tpu.memory_space<smem>>
    memref.store %95, %arg13[%c0_52, %c0_53] : memref<1x2xf32, #tpu.memory_space<smem>>
    %97 = vector.shape_cast %91 : vector<8x16xf32> to vector<1x8x16xf32>
    %cst_54 = arith.constant dense<0.000000e+00> : vector<1xf32>
    %98 = vector.multi_reduction <add>, %97, %cst_54 [1, 2] : vector<1x8x16xf32> to vector<1xf32>
    %99 = vector.shape_cast %98 : vector<1xf32> to vector<1x1x1xf32>
    %100 = vector.extract %99[0, 0, 0] : f32 from vector<1x1x1xf32>
    %c0_55 = arith.constant 0 : index
    %c1 = arith.constant 1 : index
    %101 = memref.load %arg13[%c0_55, %c1] : memref<1x2xf32, #tpu.memory_space<smem>>
    memref.store %100, %arg13[%c0_55, %c1] : memref<1x2xf32, #tpu.memory_space<smem>>
    return
  }
  func.func @transform_0(%arg0: i32) -> (i32, i32) {
    %c0_i32 = arith.constant 0 : i32
    %c0_i32_0 = arith.constant 0 : i32
    return %arg0, %c0_i32 : i32, i32
  }
  func.func @transform_1(%arg0: i32) -> (i32, i32) {
    %c0_i32 = arith.constant 0 : i32
    %c0_i32_0 = arith.constant 0 : i32
    %c0_i32_1 = arith.constant 0 : i32
    return %c0_i32, %c0_i32_0 : i32, i32
  }
  func.func @transform_2(%arg0: i32) -> (i32, i32) {
    %c0_i32 = arith.constant 0 : i32
    %c0_i32_0 = arith.constant 0 : i32
    %c0_i32_1 = arith.constant 0 : i32
    return %c0_i32, %c0_i32_0 : i32, i32
  }
  func.func @transform_3(%arg0: i32) -> (i32, i32) {
    %c0_i32 = arith.constant 0 : i32
    %c0_i32_0 = arith.constant 0 : i32
    %c0_i32_1 = arith.constant 0 : i32
    return %c0_i32, %c0_i32_0 : i32, i32
  }
  func.func @transform_4(%arg0: i32) -> (i32, i32) {
    %c0_i32 = arith.constant 0 : i32
    %c0_i32_0 = arith.constant 0 : i32
    %c0_i32_1 = arith.constant 0 : i32
    return %c0_i32, %c0_i32_0 : i32, i32
  }
  func.func @transform_5(%arg0: i32) -> (i32, i32) {
    %c0_i32 = arith.constant 0 : i32
    %c0_i32_0 = arith.constant 0 : i32
    %c0_i32_1 = arith.constant 0 : i32
    return %c0_i32, %c0_i32_0 : i32, i32
  }
  func.func @transform_6(%arg0: i32) -> (i32, i32) {
    %c0_i32 = arith.constant 0 : i32
    %c0_i32_0 = arith.constant 0 : i32
    %c0_i32_1 = arith.constant 0 : i32
    return %c0_i32, %c0_i32_0 : i32, i32
  }
  func.func @transform_7(%arg0: i32) -> (i32, i32) {
    %c0_i32 = arith.constant 0 : i32
    %c0_i32_0 = arith.constant 0 : i32
    %c0_i32_1 = arith.constant 0 : i32
    return %c0_i32, %c0_i32_0 : i32, i32
  }
  func.func @transform_8(%arg0: i32) -> (i32, i32) {
    %c0_i32 = arith.constant 0 : i32
    %c0_i32_0 = arith.constant 0 : i32
    %c0_i32_1 = arith.constant 0 : i32
    return %c0_i32, %c0_i32_0 : i32, i32
  }
  func.func @transform_9(%arg0: i32) -> (i32, i32) {
    %c0_i32 = arith.constant 0 : i32
    %c0_i32_0 = arith.constant 0 : i32
    %c0_i32_1 = arith.constant 0 : i32
    return %c0_i32, %c0_i32_0 : i32, i32
  }
  func.func @transform_10(%arg0: i32) -> (i32, i32) {
    %c0_i32 = arith.constant 0 : i32
    %c0_i32_0 = arith.constant 0 : i32
    %c0_i32_1 = arith.constant 0 : i32
    return %c0_i32, %c0_i32_0 : i32, i32
  }
  func.func @transform_11(%arg0: i32) -> (i32, i32) {
    %c0_i32 = arith.constant 0 : i32
    %c0_i32_0 = arith.constant 0 : i32
    return %arg0, %c0_i32 : i32, i32
  }
  func.func @transform_12(%arg0: i32) -> (i32, i32) {
    %c0_i32 = arith.constant 0 : i32
    %c0_i32_0 = arith.constant 0 : i32
    return %arg0, %c0_i32 : i32, i32
  }
}

</mosaic_0001>

<bundles_post_ra>
// kernel: tpu_custom_call.1
= control target key start
LH: loop header
LB: loop body
LE: loop exit
PB: predicated region body
PF: predicated region fallthrough
CT: control target
= control target key end

     0   :  { %18 = vsyncpa [#allocation3], 0  ;;  %s1882_s0 = inlined_call_operand.hbm [shape: f32[8,48], index: 0, kind: input, shape index: {}]   ;;  %s1883_s1 = inlined_call_operand.vmem [shape: bf16[48,256], index: 1, kind: input, shape index: {}]   ;;  %s1884_s2 = inlined_call_operand.vmem [shape: bf16[256,128], index: 2, kind: input, shape index: {}]   ;;  %s1885_s3 = inlined_call_operand.hbm [shape: bf16[128,256], index: 3, kind: input, shape index: {}]   ;;  %s1886_s4 = inlined_call_operand.hbm [shape: bf16[16,16], index: 4, kind: input, shape index: {}]   ;;  %s1887_s5 = inlined_call_operand.hbm [shape: bf16[16,256], index: 5, kind: input, shape index: {}]   ;;  %s1888_s6 = inlined_call_operand.hbm [shape: bf16[16,128], index: 6, kind: input, shape index: {}]   ;;  %s1889_s7 = inlined_call_operand.hbm [shape: bf16[128,256], index: 7, kind: input, shape index: {}]   ;;  %s1890_s8 = inlined_call_operand.vmem [shape: bf16[256,48], index: 8, kind: input, shape index: {}]   ;;  %s1891_s9 = inlined_call_operand.vmem [shape: f32[1,1536], index: 9, kind: input, shape index: {}]   ;;  %s1892_s10 = inlined_call_operand.vmem [shape: f32[1,16], index: 10, kind: input, shape index: {}]   ;;  %s1893_s11 = inlined_call_operand.hbm [shape: f32[8,128], index: 11, kind: output, shape index: {0}]   ;;  %s1894_s12 = inlined_call_operand.hbm [shape: f32[1,2], index: 12, kind: output, shape index: {1}]  }
   0x1   :  { %19 = vsyncpa [#allocation7], 0 }
   0x2   :  { %20 = vsyncpa [#allocation10], 0 }
   0x3   :  { %21 = vsyncpa [#allocation13], 0 }
   0x4   :  { %22 = vsyncpa [#allocation4], 0 }
   0x5   :  { %23 = vsyncpa [#allocation5], 0  ;;  %s1598_s21 = smov [#allocation6]  }
   0x6   :  { %s43_s22 = sshll.u32 %s1598_s21, 4  ;;  %s44_s22 = int_to_ptr.vmem [resolvable:$true] %s43_s22 }
   0x7   :  { %s1446_s23 = scalar_lea.vmem %s44_s22, 2048  ;;  %p1451_p1 = scmp.lt.s32.totalorder %s44_s22, %s44_s22 }
   0x8   :  { %p1447_p0 = scmp.ne.s32.totalorder %s44_s22, %s1446_s23  ;;  %p1452_p2 = scmp.lt.s32.totalorder %s1446_s23, %s1446_s23 }
   0xa   :  { %p1453_p3 = por %p1452_p2, %p1451_p1 }
   0xc   :  { %p1454_p4 = pnand %p1453_p3, %p1447_p0 }
   0xe   :  { %1457 = shalt.err (!%p1454_p4)
}
   0xf   :  { %s1599_s24 = smov 128   ;;  %s1600_s25 = smov 8  }
  0x10   :  { %49 = dma.hbm_to_vmem [thread:$0]  %s1885_s3, 2048, %s44_s22, [#allocation7], %s1599_s24, %s1599_s24, %s1600_s25  }
  0x11   :  { %s1601_s28 = smov [#allocation9]   ;;  %s1602_s30 = smov [#allocation2]  }
  0x12   :  { %s67_s29 = sshll.u32 %s1601_s28, 4  ;;  %s30_s13 = sshll.u32 %s1602_s30, 4  ;;  %s68_s29 = int_to_ptr.vmem [resolvable:$true] %s67_s29  ;;  %s31_s13 = int_to_ptr.vmem [resolvable:$true] %s30_s13 }
  0x13   :  { %s1466_s14 = scalar_lea.vmem %s68_s29, 256  ;;  %p1471_p6 = scmp.lt.s32.totalorder %s68_s29, %s68_s29 }
  0x14   :  { %p1467_p5 = scmp.ne.s32.totalorder %s68_s29, %s1466_s14  ;;  %p1472_p7 = scmp.lt.s32.totalorder %s1466_s14, %s1466_s14 }
  0x16   :  { %p1473_p8 = por %p1472_p7, %p1471_p6 }
  0x18   :  { %p1474_p9 = pnand %p1473_p8, %p1467_p5 }
  0x1a   :  { %1477 = shalt.err (!%p1474_p9)
}
  0x1b   :  { %73 = dma.hbm_to_vmem [thread:$0]  %s1887_s5, 256, %s68_s29, [#allocation10], %s1599_s24, %s1599_s24, %s1600_s25  }
  0x1c   :  { %s1486_s3 = scalar_lea.vmem %s31_s13, 128  ;;  %p1491_p11 = scmp.lt.s32.totalorder %s31_s13, %s31_s13 }
  0x1d   :  { %p1487_p10 = scmp.ne.s32.totalorder %s31_s13, %s1486_s3  ;;  %p1492_p12 = scmp.lt.s32.totalorder %s1486_s3, %s1486_s3 }
  0x1f   :  { %p1493_p13 = por %p1492_p12, %p1491_p11 }
  0x21   :  { %p1494_p0 = pnand %p1493_p13, %p1487_p10 }
  0x23   :  { %1497 = shalt.err (!%p1494_p0)
}
  0x24   :  { %33 = dma.hbm_to_vmem [thread:$0]  %s1882_s0, 128, %s31_s13, [#allocation3]  }
  0x25   :  { %s1603_s19 = smov [#allocation8]  }
  0x26   :  { %s55_s20 = sshll.u32 %s1603_s19, 4  ;;  %s56_s20 = int_to_ptr.vmem [resolvable:$true] %s55_s20 }
  0x27   :  { %s1506_s21 = scalar_lea.vmem %s56_s20, 128  ;;  %p1511_p2 = scmp.lt.s32.totalorder %s56_s20, %s56_s20 }
  0x28   :  { %p1507_p1 = scmp.ne.s32.totalorder %s56_s20, %s1506_s21  ;;  %p1512_p3 = scmp.lt.s32.totalorder %s1506_s21, %s1506_s21 }
  0x2a   :  { %p1513_p4 = por %p1512_p3, %p1511_p2 }
  0x2c   :  { %p1514_p5 = pnand %p1513_p4, %p1507_p1 }
  0x2e   :  { %1517 = shalt.err (!%p1514_p5)
}
  0x2f   :  { %s1604_s5 = smov 64   ;;  %s1605_s22 = smov 4  }
  0x30   :  { %61 = dma.hbm_to_vmem [thread:$0]  %s1886_s4, 128, %s56_s20, [#allocation7], %s1604_s5, %s1604_s5, %s1605_s22  }
  0x31   :  { %s1606_s27 = smov [#allocation11]   ;;  %s1607_s28 = smov [#allocation12]  }
  0x32   :  { %s79_s0 = sshll.u32 %s1606_s27, 4  ;;  %s91_s29 = sshll.u32 %s1607_s28, 4  ;;  %s80_s0 = int_to_ptr.vmem [resolvable:$true] %s79_s0  ;;  %s92_s29 = int_to_ptr.vmem [resolvable:$true] %s91_s29 }
  0x33   :  { %s1526_s30 = scalar_lea.vmem %s80_s0, 128  ;;  %p1531_p7 = scmp.lt.s32.totalorder %s80_s0, %s80_s0 }
  0x34   :  { %p1527_p6 = scmp.ne.s32.totalorder %s80_s0, %s1526_s30  ;;  %p1532_p8 = scmp.lt.s32.totalorder %s1526_s30, %s1526_s30 }
  0x36   :  { %p1533_p9 = por %p1532_p8, %p1531_p7 }
  0x38   :  { %p1534_p10 = pnand %p1533_p9, %p1527_p6 }
  0x3a   :  { %1537 = shalt.err (!%p1534_p10)
}
  0x3b   :  { %85 = dma.hbm_to_vmem [thread:$0]  %s1888_s6, 128, %s80_s0, [#allocation10], %s1604_s5, %s1604_s5, %s1605_s22  }
  0x3c   :  { %s1546_s4 = scalar_lea.vmem %s92_s29, 2048  ;;  %p1551_p12 = scmp.lt.s32.totalorder %s92_s29, %s92_s29 }
  0x3d   :  { %p1547_p11 = scmp.ne.s32.totalorder %s92_s29, %s1546_s4  ;;  %p1552_p13 = scmp.lt.s32.totalorder %s1546_s4, %s1546_s4 }
  0x3f   :  { %p1553_p0 = por %p1552_p13, %p1551_p12 }
  0x41   :  { %p1554_p1 = pnand %p1553_p0, %p1547_p11 }
  0x43   :  { %1557 = shalt.err (!%p1554_p1)
}
  0x44   :  { %97 = dma.hbm_to_vmem [thread:$0]  %s1889_s7, 2048, %s92_s29, [#allocation13], %s1599_s24, %s1599_s24, %s1600_s25  }
  0x45   :  { %1586 = dma.done.wait [#allocation3], 128  }
  0x46   :  { %1587 = vsyncadd [#allocation3], 4294967168 }
  0x47   :  { %1588 = dma.done.wait [#allocation7], 2176  }
  0x48   :  { %1589 = vsyncadd [#allocation7], 4294965120 }
  0x49   :  { %1590 = dma.done.wait [#allocation10], 384  }
  0x4a   :  { %1591 = vsyncadd [#allocation10], 4294966912 }
  0x4b   :  { %1592 = dma.done.wait [#allocation13], 2048  }
  0x4c   :  { %1593 = vsyncadd [#allocation13], 4294965248  ;;  %v1608_v0 = vmov 0   ;;  %v1342_v1 = vld [vmem:[%s1883_s1 + $0x24] ss:$8 sps:$4 sm:$0xff]   ;;  %v1351_v8 = vld [vmem:[%s1884_s2 + $0x78] sm:$0xff]   ;;  %v133_v35 = vlaneseq }
  0x4d   :  { %209 = vmatprep.mubr.bf16.mxu0 %v1608_v0  ;;  %v1344_v2 = vld [vmem:[%s1883_s1 + $0x20] ss:$8 sps:$4 sm:$0xff]   ;;  %187 = vmatprep.subr.bf16.mxu0 %v1342_v1  ;;  %v1345_v3 = vld [vmem:[%s1883_s1 + $0x14] ss:$8 sps:$4 sm:$0xff]   ;;  %v1347_v4 = vld [vmem:[%s1883_s1 + $0x10] ss:$8 sps:$4 sm:$0xff]  }
  0x4e   :  { %188 = vmatpush1.bf16.msra.mxu0 %v1344_v2  ;;  %v1348_v5 = vld [vmem:[%s1883_s1 + $0x4] ss:$8 sps:$4 sm:$0xff]   ;;  %v1350_v6 = vld [vmem:[%s1883_s1] ss:$8 sps:$4 sm:$0xff]   ;;  %v1352_v9 = vld [vmem:[%s1884_s2 + $0x38] sm:$0xff]   ;;  %1253 = vmatprep.subr.bf16.mxu1 %v1351_v8  ;;  %vm173_vm0 = vcmask 392192  }
  0x4f   :  { %189 = vmatprep.subr.bf16.mxu0 %v1345_v3  ;;  %v123_v7 = vld [vmem:[#allocation2] sm:$0xff]  ;;  %v1353_v10 = vld [vmem:[%s1884_s2 + $0x70] sm:$0xff]   ;;  %1254 = vmatpush3.bf16.msra.mxu1 %v1352_v9  ;;  %v1355_v12 = vld [vmem:[%s1884_s2 + $0x68] sm:$0xff]   ;;  %v134_v36 = vshrl.u32 %v133_v35, 7  ;;  %v1609_v61 = vmov 0.0   ;;  %vm1610_vm4 = vmmov 0  }
  0x50   :  { %v1354_v11 = vld [vmem:[%s1884_s2 + $0x30] sm:$0xff]   ;;  %1255 = vmatprep.subr.bf16.mxu1 %v1353_v10  ;;  %v124_v13 = vpack.c.bf16 %v123_v7, %v123_v7  ;;  %v1356_v14 = vld [vmem:[%s1884_s2 + $0x28] sm:$0xff]   ;;  %v1357_v15 = vld [vmem:[%s1884_s2 + $0x60] sm:$0xff]   ;;  %vm582_vm5 = vcmask 130048   ;;  %s1611_s3 = smov 48   ;;  %vm558_vm6 = vcmask 523648  }
  0x51   :  { %v1358_v16 = vld [vmem:[%s1884_s2 + $0x20] sm:$0xff]   ;;  %v1359_v17 = vld [vmem:[%s1884_s2 + $0x58] sm:$0xff]   ;;  %v1361_v19 = vld [vmem:[%s1884_s2 + $0x50] sm:$0xff]   ;;  %v1780_v37 = vsub.s32 0, %v134_v36  ;;  %v1785_v39 = vsub.s32 1, %v134_v36  ;;  %vm564_vm7 = vcmask 654848  }
  0x52   :  { %190 = vmatpush1.bf16.msra.mxu0 %v1347_v4  ;;  %v1360_v18 = vld [vmem:[%s1884_s2 + $0x18] sm:$0xff]   ;;  %v1362_v20 = vld [vmem:[%s1884_s2 + $0x10] sm:$0xff]   ;;  %v1363_v21 = vld [vmem:[%s1884_s2 + $0x48] sm:$0xff]   ;;  %s1612_s20 = smov 80   ;;  %vm703_vm10 = vcmask 786048   ;;  %s1614_s4 = smov [#allocation14]  }
  0x53   :  { %191 = vmatprep.subr.bf16.mxu0 %v1348_v5  ;;  %1256 = vmatpush3.bf16.msra.mxu1 %v1354_v11  ;;  %v1364_v22 = vld [vmem:[%s1884_s2 + $0x8] sm:$0xff]   ;;  %v1365_v23 = vld [vmem:[%s1884_s2 + $0x40] sm:$0xff]   ;;  %s1145_s15 = sshll.u32 %s1614_s4, 4  ;;  %s1146_s15 = int_to_ptr.vmem [resolvable:$true] %s1145_s15 }
  0x54   :  { %1257 = vmatprep.subr.bf16.mxu1 %v1355_v12  ;;  %v1366_v24 = vld [vmem:[%s1884_s2] sm:$0xff]   ;;  %v1372_v27 = vld [vmem:[#allocation6 + $0x64] ss:$8 sps:$4 sm:$0xff]   ;;  %v1370_v28 = vld [vmem:[#allocation6 + $0x60] ss:$8 sps:$4 sm:$0xff]   ;;  %s1566_s16 = scalar_lea.vmem %s1146_s15, 128  ;;  %p1571_p3 = scmp.lt.s32.totalorder %s1146_s15, %s1146_s15 }
  0x55   :  { %v1367_v25 = vld [vmem:[#allocation6 + $0x70] ss:$8 sps:$4 sm:$0xff]   ;;  %v1369_v26 = vld [vmem:[#allocation6 + $0x74] ss:$8 sps:$4 sm:$0xff]   ;;  %v1378_v31 = vld [vmem:[#allocation6 + $0x44] ss:$8 sps:$4 sm:$0xff]   ;;  %p1567_p2 = scmp.ne.s32.totalorder %s1146_s15, %s1566_s16  ;;  %p1572_p4 = scmp.lt.s32.totalorder %s1566_s16, %s1566_s16 }
  0x56   :  { %192 = vmatpush1.bf16.msra.mxu0 %v1350_v6  ;;  %v1375_v29 = vld [vmem:[#allocation6 + $0x54] ss:$8 sps:$4 sm:$0xff]   ;;  %v1373_v30 = vld [vmem:[#allocation6 + $0x50] ss:$8 sps:$4 sm:$0xff]   ;;  %v1376_v32 = vld [vmem:[#allocation6 + $0x40] ss:$8 sps:$4 sm:$0xff]  }
  0x57   :  { %1258 = vmatpush3.bf16.msra.mxu1 %v1356_v14  ;;  %513 = vmatprep.subr.bf16.mxu0 %v1369_v26  ;;  %v1381_v33 = vld [vmem:[#allocation6 + $0x34] ss:$8 sps:$4 sm:$0xff]   ;;  %v1379_v34 = vld [vmem:[#allocation6 + $0x30] ss:$8 sps:$4 sm:$0xff]   ;;  %v1384_v54 = vld [vmem:[#allocation6 + $0x24] ss:$8 sps:$4 sm:$0xff]   ;;  %p1573_p5 = por %p1572_p4, %p1571_p3 }
  0x58   :  { %1259 = vmatprep.subr.bf16.mxu1 %v1357_v15  ;;  %v131_v38 = vld [vmem:[%s1891_s9] sm:$0x3]  ;;  %v1382_v55 = vld [vmem:[#allocation6 + $0x20] ss:$8 sps:$4 sm:$0xff]   ;;  %v1387_v56 = vld [vmem:[#allocation6 + $0x14] ss:$8 sps:$4 sm:$0xff]  }
  0x59   :  { %1176 = vmatmul.mubr.msk.bf16.vlgmr.msra.gmra.mxu0 %vm173_vm0, %v124_v13  ;;  %v136_v40 = vrot.slane %v131_v38, %v1780_v37  ;;  %v140_v41 = vrot.slane %v131_v38, %v1785_v39  ;;  %v1385_v57 = vld [vmem:[#allocation6 + $0x10] ss:$8 sps:$4 sm:$0xff]   ;;  %v1390_v58 = vld [vmem:[#allocation6 + $0x4] ss:$8 sps:$4 sm:$0xff]   ;;  %v1388_v59 = vld [vmem:[#allocation6] ss:$8 sps:$4 sm:$0xff]   ;;  %p1574_p6 = pnand %p1573_p5, %p1567_p2 }
  0x5a   :  { %545 = vmatprep.mubr.bf16.mxu0 %v1608_v0  ;;  %514 = vmatpush1.bf16.msra.mxu0 %v1367_v25  ;;  %v1391_v60 = vld [vmem:[#allocation8] sm:$0xff]   ;;  %v1177_v63 = vld [vmem:[%s1891_s9 + $0x2] ss:$0 sm:$0xff]  ;;  %v421_v9 = vld [vmem:[%s1891_s9 + $0x3] sm:$0x3] }
  0x5b   :  { %1260 = vmatpush3.bf16.msra.mxu1 %v1358_v16  ;;  %515 = vmatprep.subr.bf16.mxu0 %v1372_v27  ;;  %v426_v10 = vrot.slane %v421_v9, %v1780_v37  ;;  %v430_v11 = vrot.slane %v421_v9, %v1785_v39  ;;  %v1392_v26 = vld [vmem:[#allocation9] ss:$8 sps:$4 sm:$0xff]   ;;  %v1394_v27 = vld [vmem:[#allocation9 + $0x4] ss:$8 sps:$4 sm:$0xff]   ;;  %v1210_v38 = vld [vmem:[%s1891_s9 + $0x5] ss:$0 sm:$0xff] }
  0x5c   :  { %1261 = vmatprep.subr.bf16.mxu1 %v1359_v17  ;;  %v1404_v9 = vld [vmem:[#allocation12 + $0x54] ss:$8 sps:$4 sm:$0xff]  }
  0x5e   :  { %516 = vmatpush1.bf16.msra.mxu0 %v1370_v28 }
  0x5f   :  { %1262 = vmatpush3.bf16.msra.mxu1 %v1360_v18  ;;  %517 = vmatprep.subr.bf16.mxu0 %v1375_v29 }
  0x60   :  { %1263 = vmatprep.subr.bf16.mxu1 %v1361_v19 }
  0x62   :  { %518 = vmatpush1.bf16.msra.mxu0 %v1373_v30 }
  0x63   :  { %1264 = vmatpush3.bf16.msra.mxu1 %v1362_v20  ;;  %519 = vmatprep.subr.bf16.mxu0 %v1378_v31 }
  0x64   :  { %1265 = vmatprep.subr.bf16.mxu1 %v1363_v21 }
  0x66   :  { %520 = vmatpush1.bf16.msra.mxu0 %v1376_v32 }
  0x67   :  { %1266 = vmatpush3.bf16.msra.mxu1 %v1364_v22  ;;  %521 = vmatprep.subr.bf16.mxu0 %v1381_v33 }
  0x68   :  { %1267 = vmatprep.subr.bf16.mxu1 %v1365_v23 }
  0x6a   :  { %522 = vmatpush1.bf16.msra.mxu0 %v1379_v34 }
  0x6b   :  { %1268 = vmatpush3.bf16.msra.mxu1 %v1366_v24  ;;  %523 = vmatprep.subr.bf16.mxu0 %v1384_v54 }
  0x6c   :  { %1301 = vmatprep.subr.bf16.mxu1 %v1609_v61 }
  0x6e   :  { %524 = vmatpush1.bf16.msra.mxu0 %v1382_v55  ;;  %v1252_v55 = vld [vmem:[%s1892_s10] ss:$0 sm:$0xff] }
  0x6f   :  { %525 = vmatprep.subr.bf16.mxu0 %v1387_v56 }
  0x72   :  { %526 = vmatpush1.bf16.msra.mxu0 %v1385_v57 }
  0x73   :  { %527 = vmatprep.subr.bf16.mxu0 %v1390_v58 }
  0x76   :  { %528 = vmatpush1.bf16.msra.mxu0 %v1388_v59 }
  0x77   :  { %1307 = vmatprep.subr.bf16.mxu0 %v1609_v61 }
 0x119   :  { %v211_v42 = vpop.f32.mrf.mxu0 }
 0x11a   :  { %v212_v43 = vadd.f32 %v211_v42, %v136_v40 }
 0x11b   :  { %v213_v44 = vpop.f32.mrf.mxu0 }
 0x11c   :  { %vm218_vm1 = vcmp.gt.f32.partialorder %v212_v43, 0.0  ;;  %v220_v45 = vmul.f32 0.01, %v212_v43  ;;  %v214_v46 = vadd.f32 %v213_v44, %v140_v41 }
 0x11d   :  { %v215_v47 = vpop.f32.mrf.mxu0 }
 0x11e   :  { %vm219_vm2 = vcmp.gt.f32.partialorder %v214_v46, 0.0  ;;  %v221_v48 = vmul.f32 0.01, %v214_v46  ;;  %v222_v50 = vsel %vm218_vm1, %v212_v43, %v220_v45 }
 0x11f   :  { %v216_v49 = vpop.f32.mrf.mxu0  ;;  %v224_v53 = vpack.c.bf16 %v222_v50, %v222_v50 }
 0x120   :  { %v223_v51 = vsel %vm219_vm2, %v214_v46, %v221_v48  ;;  %v1395_v48 = vld [vmem:[#allocation11] sm:$0xff]  }
 0x121   :  { %v225_v52 = vpack.c.bf16 %v223_v51, %v223_v51  ;;  %v632_v49 = vld [vmem:[%s1891_s9 + $0x6] sm:$0x3] }
 0x122   :  { %v637_v50 = vrot.slane %v632_v49, %v1780_v37  ;;  %v641_v51 = vrot.slane %v632_v49, %v1785_v39 }
 0x123   :  { %393 = vmatprep.mubr.bf16.mxu1 %v225_v52 }
 0x124   :  { %394 = vmatmul.mubr.bf16.vlgmr.msra.gmra.mxu1 %v224_v53 }
 0x125   :  { %1302 = vmatpush3.bf16.msra.mxu1 %v1391_v60  ;;  %1303 = vmatprep.mubr.msk.bf16.mxu1 %vm1610_vm4, %v1609_v61 }
 0x126   :  { %671 = vmatprep.subr.bf16.mxu1 %v1394_v27  ;;  %v1426_v27 = vld [vmem:[%s1890_s8 + $0x60] sm:$0xff]  }
 0x1e4   :  { %v1269_v62 = vpop.f32.mrf.mxu1 }
 0x1e6   :  { %v1270_v1 = vpop.f32.mrf.mxu1 }
 0x1e7   :  { %v1271_v2 = vadd.f32 %v1270_v1, %v1269_v62 }
 0x1e8   :  { %v1272_v3 = vpop.f32.mrf.mxu1 }
 0x1e9   :  { %v396_v4 = vadd.f32 %v1271_v2, %v1177_v63 }
 0x1ea   :  { %v1273_v5 = vpop.f32.mrf.mxu1 }
 0x1eb   :  { %vm401_vm3 = vcmp.gt.f32.partialorder %v396_v4, 0.0  ;;  %v402_v6 = vmul.f32 0.01, %v396_v4  ;;  %v1396_v5 = vld [vmem:[#allocation12 + $0x70] ss:$8 sps:$4 sm:$0xff]  }
 0x1ed   :  { %v403_v7 = vsel %vm401_vm3, %v396_v4, %v402_v6  ;;  %v1398_v6 = vld [vmem:[#allocation12 + $0x74] ss:$8 sps:$4 sm:$0xff]  }
 0x1ee   :  { %v404_v8 = vpack.c.bf16 %v403_v7, %v403_v7  ;;  %v1401_v7 = vld [vmem:[#allocation12 + $0x64] ss:$8 sps:$4 sm:$0xff]  }
 0x1f0   :  { %546 = vmatmul.mubr.bf16.vlgmr.msra.gmra.mxu0 %v404_v8  ;;  %v1399_v8 = vld [vmem:[#allocation12 + $0x60] ss:$8 sps:$4 sm:$0xff]  }
 0x1f1   :  { %1309 = vmatprep.mubr.msk.bf16.mxu0 %vm1610_vm4, %v1609_v61  ;;  %1308 = vmatpush3.bf16.msra.mxu0 %v1395_v48 }
 0x2b0   :  { %v547_v12 = vpop.f32.mrf.mxu0 }
 0x2b1   :  { %v548_v13 = vadd.f32 %v547_v12, %v426_v10  ;;  %v1402_v10 = vld [vmem:[#allocation12 + $0x50] ss:$8 sps:$4 sm:$0xff]   ;;  %v1405_v12 = vld [vmem:[#allocation12 + $0x40] ss:$8 sps:$4 sm:$0xff]  }
 0x2b2   :  { %v549_v14 = vpop.f32.mrf.mxu0 }
 0x2b3   :  { %v566_v15 = vpack.c.bf16 %v548_v13, %v548_v13  ;;  %v550_v16 = vadd.f32 %v549_v14, %v430_v11  ;;  %555 = vrot.lane.b32.xlu1 %v548_v13, %s1611_s3  ;;  %v1102_v21 = vmul.f32 %v548_v13, %v548_v13  ;;  %v1407_v11 = vld [vmem:[#allocation12 + $0x44] ss:$8 sps:$4 sm:$0xff]   ;;  %v1410_v13 = vld [vmem:[#allocation12 + $0x34] ss:$8 sps:$4 sm:$0xff]   ;;  %v1408_v14 = vld [vmem:[#allocation12 + $0x30] ss:$8 sps:$4 sm:$0xff]  }
 0x2b4   :  { %v551_v17 = vpop.f32.mrf.mxu0 }
 0x2b5   :  { %v1104_v18 = vmul.f32 1.442695, %v550_v16  ;;  %1304 = vmatmul.mubr.msk.bf16.vlgmr.msra.gmra.mxu1 %vm582_vm5, %v566_v15  ;;  %v1101_v20 = vadd.f32 1.0, %v550_v16  ;;  %v1413_v15 = vld [vmem:[#allocation12 + $0x24] ss:$8 sps:$4 sm:$0xff]  }
 0x2b6   :  { %v552_v19 = vpop.f32.mrf.mxu0  ;;  %689 = vmatprep.mubr.bf16.mxu1 %v1608_v0  ;;  %672 = vmatpush1.bf16.msra.mxu1 %v1392_v26  ;;  %v1416_v17 = vld [vmem:[#allocation12 + $0x14] ss:$8 sps:$4 sm:$0xff]   ;;  %v1425_v26 = vld [vmem:[%s1890_s8 + $0x28] sm:$0xff]  }
 0x2b7   :  { %1436 = vpow2.f32 %v1104_v18  ;;  %561 = vrot.lane.b32.xlu1 %v550_v16, %s1604_s5  ;;  %v1103_v22 = vsub.f32 %v1101_v20, %v1102_v21  ;;  %876 = vmatprep.subr.bf16.mxu1 %v1398_v6  ;;  %v1411_v16 = vld [vmem:[#allocation12 + $0x20] ss:$8 sps:$4 sm:$0xff]   ;;  %v1414_v18 = vld [vmem:[#allocation12 + $0x10] ss:$8 sps:$4 sm:$0xff]   ;;  %v1419_v19 = vld [vmem:[#allocation12 + $0x4] ss:$8 sps:$4 sm:$0xff]  }
 0x2b8   :  { %v1417_v20 = vld [vmem:[#allocation12] ss:$8 sps:$4 sm:$0xff]   ;;  %v1420_v21 = vld [vmem:[%s1890_s8 + $0x78] sm:$0xff]  }
 0x2b9   :  { %1279 = vmatprep.subr.bf16.mxu0 %v1420_v21 }
 0x2c4   :  { %v1437_v23 = vpop.eup %1436 }
 0x2c5   :  { %v1106_v24 = vsub.f32 %v1103_v22, %v1437_v23  ;;  %v1421_v22 = vld [vmem:[%s1890_s8 + $0x38] sm:$0xff]   ;;  %v1422_v23 = vld [vmem:[%s1890_s8 + $0x70] sm:$0xff]  }
 0x2c7   :  { %v1115_v25 = vsel %vm582_vm5, %v1106_v24, 0.0  ;;  %v1423_v24 = vld [vmem:[%s1890_s8 + $0x30] sm:$0xff]  }
 0x2c8   :  { %1116 = vadd.xlane.f32.xlu0 %v1115_v25  ;;  %v1424_v25 = vld [vmem:[%s1890_s8 + $0x68] sm:$0xff]  }
 0x325   :  { %v556_v28 = vpop.permute.xlu1 %555 }
 0x326   :  { %559 = vst.msk [vmem:[#allocation14] sm:$0xff] %vm558_vm6, %v556_v28  ;;  %v1427_v28 = vld [vmem:[%s1890_s8 + $0x20] sm:$0xff]  }
 0x329   :  { %v562_v29 = vpop.permute.xlu1 %561 }
 0x32a   :  { %565 = vst.msk [vmem:[#allocation14] sm:$0xff] %vm564_vm7, %v562_v29  ;;  %v1428_v29 = vld [vmem:[%s1890_s8 + $0x58] sm:$0xff]  }
 0x351   :  { %v1117_v30 = vpop.xlane.xlu0 %1116 }
 0x352   :  { %v1118_v31 = vrot.slane %v1117_v30, 4 }
 0x354   :  { %v1119_v32 = vadd.f32 %v1118_v31, %v1117_v30  ;;  %v1429_v30 = vld [vmem:[%s1890_s8 + $0x18] sm:$0xff]   ;;  %v1430_v31 = vld [vmem:[%s1890_s8 + $0x50] sm:$0xff]  }
 0x356   :  { %v1120_v33 = vrot.slane %v1119_v32, 2 }
 0x358   :  { %v1121_v34 = vadd.f32 %v1120_v33, %v1119_v32 }
 0x35a   :  { %v1122_v35 = vrot.slane %v1121_v34, 1 }
 0x35c   :  { %v1123_v36 = vadd.f32 %v1122_v35, %v1121_v34 }
 0x35e   :  { %1321 = vpush %v1123_v36 }
 0x375   :  { %v620_v40 = vpop.f32.mrf.mxu1 }
 0x376   :  { %v621_v41 = vadd.f32 %v1210_v38, %v620_v40 }
 0x377   :  { %v1305_v42 = vpop.f32.mrf.mxu1 }
 0x378   :  { %vm626_vm8 = vcmp.gt.f32.partialorder %v621_v41, 0.0  ;;  %v627_v43 = vmul.f32 0.01, %v621_v41  ;;  %v1216_v42 = vld [vmem:[%s1891_s9 + $0x8] ss:$0 sm:$0xff] }
 0x379   :  { %v623_v44 = vpop.f32.mrf.mxu1 }
 0x37a   :  { %v628_v45 = vsel %vm626_vm8, %v621_v41, %v627_v43 }
 0x37b   :  { %v629_v46 = vpack.c.bf16 %v628_v45, %v628_v45  ;;  %v1306_v47 = vpop.f32.mrf.mxu1 }
 0x37d   :  { %1215 = vmatmul.mubr.msk.bf16.vlgmr.msra.gmra.mxu1 %vm582_vm5, %v629_v46 }
 0x37e   :  { %908 = vmatprep.mubr.bf16.mxu1 %v1608_v0  ;;  %877 = vmatpush1.bf16.msra.mxu1 %v1396_v5 }
 0x37f   :  { %878 = vmatprep.subr.bf16.mxu1 %v1401_v7 }
 0x382   :  { %879 = vmatpush1.bf16.msra.mxu1 %v1399_v8 }
 0x383   :  { %880 = vmatprep.subr.bf16.mxu1 %v1404_v9 }
 0x386   :  { %881 = vmatpush1.bf16.msra.mxu1 %v1402_v10 }
 0x387   :  { %882 = vmatprep.subr.bf16.mxu1 %v1407_v11 }
 0x38a   :  { %883 = vmatpush1.bf16.msra.mxu1 %v1405_v12 }
 0x38b   :  { %884 = vmatprep.subr.bf16.mxu1 %v1410_v13 }
 0x38e   :  { %885 = vmatpush1.bf16.msra.mxu1 %v1408_v14 }
 0x38f   :  { %s1322_s18 = spop %1321  ;;  %886 = vmatprep.subr.bf16.mxu1 %v1413_v15 }
 0x390   :  { %1126 = sst [smem:[#allocation15]] %s1322_s18 }
 0x392   :  { %887 = vmatpush1.bf16.msra.mxu1 %v1411_v16 }
 0x393   :  { %888 = vmatprep.subr.bf16.mxu1 %v1416_v17 }
 0x396   :  { %889 = vmatpush1.bf16.msra.mxu1 %v1414_v18 }
 0x397   :  { %890 = vmatprep.subr.bf16.mxu1 %v1419_v19 }
 0x39a   :  { %891 = vmatpush1.bf16.msra.mxu1 %v1417_v20 }
 0x43d   :  { %v691_v52 = vpop.f32.mrf.mxu1 }
 0x43e   :  { %v692_v53 = vadd.f32 %v691_v52, %v637_v50  ;;  %v1432_v52 = vld [vmem:[%s1890_s8 + $0x48] sm:$0xff]  }
 0x43f   :  { %v693_v54 = vpop.f32.mrf.mxu1 }
 0x440   :  { %v1315_v0 = vcvt.f32.s32 %v692_v53  ;;  %v694_v56 = vadd.f32 %v693_v54, %v641_v51  ;;  %v1313_v60 = vand.u32 2147483647, %v692_v53  ;;  %v1318_v63 = vand.u32 2147483648, %v692_v53  ;;  %v1431_v51 = vld [vmem:[%s1890_s8 + $0x10] sm:$0xff]   ;;  %v1434_v54 = vld [vmem:[%s1890_s8 + $0x40] sm:$0xff]  }
 0x441   :  { %v695_v57 = vpop.f32.mrf.mxu1 }
 0x442   :  { %v1316_v58 = vcvt.s32.f32 %v1315_v0  ;;  %v1114_v59 = vmul.f32 %v1252_v55, %v694_v56  ;;  %vm1314_vm9 = vcmp.lt.f32.partialorder %v1313_v60, 8388608.0  ;;  %v1435_v55 = vld [vmem:[%s1890_s8] sm:$0xff]   ;;  %v784_v0 = vld [vmem:[%s1891_s9 + $0x9] sm:$0x3] }
 0x443   :  { %v696_v61 = vpop.f32.mrf.mxu1  ;;  %v789_v56 = vrot.slane %v784_v0, %v1780_v37  ;;  %v793_v57 = vrot.slane %v784_v0, %v1785_v39  ;;  %v1235_v39 = vld [vmem:[%s1891_s9 + $0xb] ss:$0 sm:$0xff] }
 0x444   :  { %v1317_v62 = vand.u32 2147483647, %v1316_v58  ;;  %v1127_v1 = vsel %vm582_vm5, %v1114_v59, 0.0 }
 0x445   :  { %1128 = vadd.xlane.f32.xlu0 %v1127_v1 }
 0x446   :  { %v1319_v2 = vor.u32 %v1318_v63, %v1317_v62 }
 0x448   :  { %v1320_v3 = vsel %vm1314_vm9, %v1319_v2, %v692_v53  ;;  %v1433_v53 = vld [vmem:[%s1890_s8 + $0x8] sm:$0xff]   ;;  %s1613_s8 = smov [#allocation15]  }
 0x449   :  { %v705_v4 = vpack.c.bf16 %v1320_v3, %v1320_v3 }
 0x44b   :  { %1310 = vmatmul.mubr.msk.bf16.vlgmr.msra.gmra.mxu0 %vm582_vm5, %v705_v4 }
 0x44c   :  { %1280 = vmatpush3.bf16.msra.mxu0 %v1421_v22 }
 0x44d   :  { %1281 = vmatprep.subr.bf16.mxu0 %v1422_v23 }
 0x450   :  { %1282 = vmatpush3.bf16.msra.mxu0 %v1423_v24 }
 0x451   :  { %1283 = vmatprep.subr.bf16.mxu0 %v1424_v25 }
 0x454   :  { %1284 = vmatpush3.bf16.msra.mxu0 %v1425_v26 }
 0x455   :  { %1285 = vmatprep.subr.bf16.mxu0 %v1426_v27 }
 0x458   :  { %1286 = vmatpush3.bf16.msra.mxu0 %v1427_v28 }
 0x459   :  { %1287 = vmatprep.subr.bf16.mxu0 %v1428_v29 }
 0x45b   :  { %700 = vrot.lane.b32.xlu0 %v1320_v3, %s1612_s20 }
 0x45c   :  { %1288 = vmatpush3.bf16.msra.mxu0 %v1429_v30 }
 0x45d   :  { %1289 = vmatprep.subr.bf16.mxu0 %v1430_v31 }
 0x460   :  { %1290 = vmatpush3.bf16.msra.mxu0 %v1431_v51 }
 0x461   :  { %1291 = vmatprep.subr.bf16.mxu0 %v1432_v52 }
 0x464   :  { %1292 = vmatpush3.bf16.msra.mxu0 %v1433_v53 }
 0x465   :  { %1293 = vmatprep.subr.bf16.mxu0 %v1434_v54 }
 0x468   :  { %1294 = vmatpush3.bf16.msra.mxu0 %v1435_v55 }
 0x4ce   :  { %v1129_v32 = vpop.xlane.xlu0 %1128 }
 0x4cf   :  { %v1130_v33 = vrot.slane %v1129_v32, 4 }
 0x4d1   :  { %v1131_v34 = vadd.f32 %v1130_v33, %v1129_v32 }
 0x4d2   :  { %v701_v35 = vpop.permute.xlu0 %700 }
 0x4d3   :  { %v1132_v36 = vrot.slane %v1131_v34, 2  ;;  %704 = vst.msk [vmem:[#allocation14] sm:$0xff] %vm703_vm10, %v701_v35 }
 0x4d5   :  { %v1133_v38 = vadd.f32 %v1132_v36, %v1131_v34 }
 0x4d7   :  { %v1134_v40 = vrot.slane %v1133_v38, 1 }
 0x4d9   :  { %v1135_v41 = vadd.f32 %v1134_v40, %v1133_v38 }
 0x4db   :  { %1323 = vpush %v1135_v41 }
 0x50b   :  { %v758_v43 = vpop.f32.mrf.mxu0 }
 0x50c   :  { %v759_v44 = vadd.f32 %v1216_v42, %v758_v43  ;;  %s1324_s25 = spop %1323 }
 0x50d   :  { %1138 = sst [smem:[#allocation15 + $0x1]] %s1324_s25  ;;  %v1311_v45 = vpop.f32.mrf.mxu0 }
 0x50e   :  { %vm764_vm11 = vcmp.gt.f32.partialorder %v759_v44, 0.0  ;;  %v765_v46 = vmul.f32 0.01, %v759_v44  ;;  %1156 = dma.smem_to_hbm %s1613_s8, 16, %s1894_s12, [#allocation5]  }
 0x50f   :  { %v761_v47 = vpop.f32.mrf.mxu0 }
 0x510   :  { %v766_v48 = vsel %vm764_vm11, %v759_v44, %v765_v46 }
 0x511   :  { %v767_v49 = vpack.c.bf16 %v766_v48, %v766_v48  ;;  %v1312_v50 = vpop.f32.mrf.mxu0 }
 0x513   :  { %909 = vmatmul.mubr.bf16.vlgmr.msra.gmra.mxu1 %v767_v49 }
 0x5d3   :  { %v910_v58 = vpop.f32.mrf.mxu1 }
 0x5d4   :  { %v911_v59 = vadd.f32 %v910_v58, %v789_v56 }
 0x5d5   :  { %v912_v60 = vpop.f32.mrf.mxu1 }
 0x5d6   :  { %vm917_vm12 = vcmp.gt.f32.partialorder %v911_v59, 0.0  ;;  %v919_v61 = vmul.f32 0.01, %v911_v59  ;;  %v913_v62 = vadd.f32 %v912_v60, %v793_v57 }
 0x5d7   :  { %v914_v63 = vpop.f32.mrf.mxu1 }
 0x5d8   :  { %vm918_vm13 = vcmp.gt.f32.partialorder %v913_v62, 0.0  ;;  %v920_v1 = vmul.f32 0.01, %v913_v62  ;;  %v921_v2 = vsel %vm917_vm12, %v911_v59, %v919_v61 }
 0x5d9   :  { %v915_v3 = vpop.f32.mrf.mxu1  ;;  %v923_v6 = vpack.c.bf16 %v921_v2, %v921_v2 }
 0x5da   :  { %v922_v4 = vsel %vm918_vm13, %v913_v62, %v920_v1 }
 0x5db   :  { %v924_v5 = vpack.c.bf16 %v922_v4, %v922_v4 }
 0x5dd   :  { %1092 = vmatprep.mubr.bf16.mxu0 %v924_v5 }
 0x5de   :  { %1093 = vmatmul.mubr.bf16.vlgmr.msra.gmra.mxu0 %v923_v6 }
 0x69e   :  { %v1295_v37 = vpop.f32.mrf.mxu0 }
 0x6a0   :  { %v1296_v7 = vpop.f32.mrf.mxu0 }
 0x6a1   :  { %v1297_v8 = vadd.f32 %v1296_v7, %v1295_v37 }
 0x6a2   :  { %v1298_v9 = vpop.f32.mrf.mxu0 }
 0x6a3   :  { %v1095_v10 = vadd.f32 %v1297_v8, %v1235_v39 }
 0x6a4   :  { %v1299_v11 = vpop.f32.mrf.mxu0 }
 0x6a5   :  { %1100 = vst.msk [vmem:[#allocation14] sm:$0xff] %vm173_vm0, %v1095_v10 }
 0x6a6   :  { %1577 = shalt.err (!%p1574_p6)
}
 0x6a7   :  { %1148 = dma.vmem_to_hbm [thread:$0]  %s1146_s15, 128, %s1893_s11, [#allocation4]  }
 0x6a8   :  { %1594 = dma.done.wait [#allocation4], 128  }
 0x6a9   :  { %1595 = vsyncadd [#allocation4], 4294967168 }
 0x6aa   :  { %1596 = dma.done.wait [#allocation5], 16  }
 0x6ab   :  { %1597 = vsyncadd [#allocation5], 4294967280 }
 0x6ac   :  { %1163 = sfence }
 0x6ad   :  { %1164 = vsyncpa [#allocation3], 1 }
 0x6ae   :  { %1165 = vsyncpa [#allocation7], 1 }
 0x6af   :  { %1166 = vsyncpa [#allocation10], 1 }
 0x6b0   :  { %1167 = vsyncpa [#allocation13], 1 }
 0x6b1   :  { %1168 = vsyncpa [#allocation4], 1 }
 0x6b2   :  { %1169 = vsyncpa [#allocation5], 1 }

</bundles_post_ra>
